<compile_context>
chip_gen: v5e
topology: v5e:2x2
jax: 0.10.0
libtpu: 0.0.40
codegen_flags: <defaults>
</compile_context>

<pallas_src>
import jax
import jax.numpy as jnp
from jax.experimental import pallas as pl
from jax.experimental.pallas import tpu as pltpu

HEAD_WIDTH = 128  # fused (value | policy | zero-pad) head output width (lane-dense)


def rescuer_agent_kernel(x_ref, w1_ref, b1_ref, w2_ref, b2_ref, wh_ref, bh_ref, out_ref):
    # One batch tile per grid step; weights are VMEM-resident across steps.
    x = x_ref[...].astype(jnp.bfloat16)
    # feature_layer: Linear -> ReLU -> Linear -> ReLU (f32 accumulation on MXU)
    h1 = jnp.dot(x, w1_ref[...], preferred_element_type=jnp.float32) + b1_ref[...]
    h1 = jnp.maximum(h1, 0.0)
    h2 = jnp.dot(h1.astype(jnp.bfloat16), w2_ref[...],
                 preferred_element_type=jnp.float32) + b2_ref[...]
    h2 = jnp.maximum(h2, 0.0)
    # fused value+policy head: single matmul, single lane-dense 128-wide store
    out_ref[...] = (jnp.dot(h2.astype(jnp.bfloat16), wh_ref[...],
                            preferred_element_type=jnp.float32) + bh_ref[...])


def rescuer_agent_forward(x, params, *, tile_b=256):
    """x: [B, state_dim] float32.  params: fused/bf16 params from prepare_params().
    Returns (value [B,1], policy_logits [B,action_dim])."""
    B, state_dim = x.shape
    hidden = params["w2"].shape[0]
    action_dim = params["action_dim"]
    assert 1 + action_dim <= HEAD_WIDTH, "action_dim too large for fused head"

    # Pad batch up to a multiple of the batch tile (rows are sliced off afterwards).
    padded_b = max(tile_b, -(-B // tile_b) * tile_b)
    if padded_b != B:
        x = jnp.pad(x, ((0, padded_b - B), (0, 0)))
    grid = (padded_b // tile_b,)

    def resident(shape):
        # Weight/bias blocks: full array, same block every grid step -> stays in VMEM.
        return pl.BlockSpec(shape, lambda i: (0, 0))

    arrays = (params["w1"], params["b1"], params["w2"], params["b2"],
              params["wh"], params["bh"])
    flops = 2 * padded_b * (state_dim * hidden + hidden * hidden + hidden * HEAD_WIDTH)
    bytes_accessed = (int(x.size) * x.dtype.itemsize
                      + sum(int(a.size) * a.dtype.itemsize for a in arrays)
                      + padded_b * HEAD_WIDTH * 4)

    f = pl.pallas_call(
        rescuer_agent_kernel,
        out_shape=jax.ShapeDtypeStruct((padded_b, HEAD_WIDTH), jnp.float32),
        grid=grid,
        in_specs=[
            pl.BlockSpec((tile_b, state_dim), lambda i: (i, 0)),   # x: tiled over B
            resident((state_dim, hidden)),                         # w1 (bf16)
            resident((1, hidden)),                                 # b1 (f32)
            resident((hidden, hidden)),                            # w2 (bf16)
            resident((1, hidden)),                                 # b2 (f32)
            resident((hidden, HEAD_WIDTH)),                        # fused head W (bf16)
            resident((1, HEAD_WIDTH)),                             # fused head b (f32)
        ],
        out_specs=pl.BlockSpec((tile_b, HEAD_WIDTH), lambda i: (i, 0)),
        compiler_params=pltpu.CompilerParams(dimension_semantics=("parallel",)),
        cost_estimate=pl.CostEstimate(flops=flops, transcendentals=0,
                                      bytes_accessed=bytes_accessed),
    )
    fused = f(x, params["w1"], params["b1"], params["w2"], params["b2"],
              params["wh"], params["bh"])

    value = fused[:B, 0:1]
    policy_logits = fused[:B, 1:1 + action_dim]
    return value, policy_logits


def init_params(key, state_dim, action_dim, hidden_dim=128):
    """Deterministic synthetic init (PyTorch-like uniform fan-in scaling), f32."""
    ks = jax.random.split(key, 8)

    def lin(kw, kb, fan_in, fan_out):
        bound = 1.0 / jnp.sqrt(fan_in)
        w = jax.random.uniform(kw, (fan_in, fan_out), jnp.float32, -bound, bound)
        b = jax.random.uniform(kb, (1, fan_out), jnp.float32, -bound, bound)
        return w, b

    w1, b1 = lin(ks[0], ks[1], state_dim, hidden_dim)
    w2, b2 = lin(ks[2], ks[3], hidden_dim, hidden_dim)
    wv, bv = lin(ks[4], ks[5], hidden_dim, 1)
    wp, bp = lin(ks[6], ks[7], hidden_dim, action_dim)
    return dict(w1=w1, b1=b1, w2=w2, b2=b2, wv=wv, bv=bv, wp=wp, bp=bp)


def prepare_params(raw, action_dim):
    """Fuse value+policy heads into one zero-padded 128-wide head, cast weights bf16."""
    hidden = raw["w2"].shape[1]
    wh = jnp.zeros((hidden, HEAD_WIDTH), jnp.float32)
    wh = wh.at[:, 0:1].set(raw["wv"]).at[:, 1:1 + action_dim].set(raw["wp"])
    bh = jnp.zeros((1, HEAD_WIDTH), jnp.float32)
    bh = bh.at[:, 0:1].set(raw["bv"]).at[:, 1:1 + action_dim].set(raw["bp"])
    return dict(
        w1=raw["w1"].astype(jnp.bfloat16), b1=raw["b1"],
        w2=raw["w2"].astype(jnp.bfloat16), b2=raw["b2"],
        wh=wh.astype(jnp.bfloat16), bh=bh,
        action_dim=action_dim,
    )


def reference_forward(x, p):
    """Pure-JAX reference using the same (bf16-valued) weights, f32 math."""
    w1 = p["w1"].astype(jnp.float32)
    w2 = p["w2"].astype(jnp.float32)
    wh = p["wh"].astype(jnp.float32)
    h1 = jnp.maximum(x @ w1 + p["b1"], 0.0)
    h2 = jnp.maximum(h1 @ w2 + p["b2"], 0.0)
    out = h2 @ wh + p["bh"]
    a = p["action_dim"]
    return out[:, 0:1], out[:, 1:1 + a]


if __name__ == "__main__":
    key = jax.random.PRNGKey(0)
    k_x, k_p = jax.random.split(key)

    batch = 2
    state_dim = 16
    action_dim = 4
    hidden_dim = 128

    x = jax.random.normal(k_x, (batch, state_dim), jnp.float32)
    raw = init_params(k_p, state_dim, action_dim, hidden_dim)
    params = prepare_params(raw, action_dim)

    value, policy_logits = rescuer_agent_forward(x, params)
    value, policy_logits = jax.block_until_ready((value, policy_logits))

    v_ref, p_ref = reference_forward(x, params)
    assert value.shape == (batch, 1)
    assert policy_logits.shape == (batch, action_dim)
    # bf16 weights/activations in the kernel (f32 accumulation) -> loosened tolerance
    assert jnp.allclose(value, v_ref, atol=5e-2, rtol=5e-2)
    assert jnp.allclose(policy_logits, p_ref, atol=5e-2, rtol=5e-2)

    print("KERNEL_OK")
</pallas_src>

<mosaic_0001>
module attributes {stable_mosaic.version = 11 : i64} {
  func.func @rescuer_agent_kernel(%arg0: i32, %arg1: memref<256x16xf32, #tpu.memory_space<vmem>>, %arg2: memref<16x128xbf16, #tpu.memory_space<vmem>>, %arg3: memref<1x128xf32, #tpu.memory_space<vmem>>, %arg4: memref<128x128xbf16, #tpu.memory_space<vmem>>, %arg5: memref<1x128xf32, #tpu.memory_space<vmem>>, %arg6: memref<128x128xbf16, #tpu.memory_space<vmem>>, %arg7: memref<1x128xf32, #tpu.memory_space<vmem>>, %arg8: memref<256x128xf32, #tpu.memory_space<vmem>>) attributes {dimension_semantics = [#tpu.dimension_semantics<parallel>], iteration_bounds = array<i64: 1>, scalar_prefetch = 0 : i64, scratch_operands = 0 : i64, tpu.core_type = #tpu.core_type<tc>, window_params = [{transform_indices = @transform_0, window_bounds = array<i64: 256, 16>}, {pipeline_mode = #tpu.pipeline_mode<synchronous>, transform_indices = @transform_1, window_bounds = array<i64: 16, 128>}, {pipeline_mode = #tpu.pipeline_mode<synchronous>, transform_indices = @transform_2, window_bounds = array<i64: 1, 128>}, {pipeline_mode = #tpu.pipeline_mode<synchronous>, transform_indices = @transform_3, window_bounds = array<i64: 128, 128>}, {pipeline_mode = #tpu.pipeline_mode<synchronous>, transform_indices = @transform_4, window_bounds = array<i64: 1, 128>}, {pipeline_mode = #tpu.pipeline_mode<synchronous>, transform_indices = @transform_5, window_bounds = array<i64: 128, 128>}, {pipeline_mode = #tpu.pipeline_mode<synchronous>, transform_indices = @transform_6, window_bounds = array<i64: 1, 128>}, {transform_indices = @transform_7, window_bounds = array<i64: 256, 128>}]} {
    %c0 = arith.constant 0 : index
    %c0_0 = arith.constant 0 : index
    %0 = vector.load %arg1[%c0, %c0_0] : memref<256x16xf32, #tpu.memory_space<vmem>>, vector<256x16xf32>
    %1 = arith.truncf %0 : vector<256x16xf32> to vector<256x16xbf16>
    %c0_1 = arith.constant 0 : index
    %c0_2 = arith.constant 0 : index
    %2 = vector.load %arg2[%c0_1, %c0_2] : memref<16x128xbf16, #tpu.memory_space<vmem>>, vector<16x128xbf16>
    %cst = arith.constant dense<0.000000e+00> : vector<256x128xf32>
    %3 = tpu.matmul %1, %2, %cst {dimension_numbers = #tpu.dot_dimension_numbers<[1], [0], [0], [1], [0, 0, 1, 1], [], []>} : vector<256x16xbf16>, vector<16x128xbf16>, vector<256x128xf32> -> vector<256x128xf32>
    %c0_3 = arith.constant 0 : index
    %c0_4 = arith.constant 0 : index
    %4 = vector.load %arg3[%c0_3, %c0_4] : memref<1x128xf32, #tpu.memory_space<vmem>>, vector<1x128xf32>
    %5 = vector.broadcast %4 : vector<1x128xf32> to vector<256x128xf32>
    %6 = arith.addf %3, %5 : vector<256x128xf32>
    %cst_5 = arith.constant 0.000000e+00 : f32
    %7 = vector.broadcast %cst_5 : f32 to vector<256x128xf32>
    %8 = arith.maximumf %6, %7 : vector<256x128xf32>
    %9 = arith.truncf %8 : vector<256x128xf32> to vector<256x128xbf16>
    %c0_6 = arith.constant 0 : index
    %c0_7 = arith.constant 0 : index
    %10 = vector.load %arg4[%c0_6, %c0_7] : memref<128x128xbf16, #tpu.memory_space<vmem>>, vector<128x128xbf16>
    %cst_8 = arith.constant dense<0.000000e+00> : vector<256x128xf32>
    %11 = tpu.matmul %9, %10, %cst_8 {dimension_numbers = #tpu.dot_dimension_numbers<[1], [0], [0], [1], [0, 0, 1, 1], [], []>} : vector<256x128xbf16>, vector<128x128xbf16>, vector<256x128xf32> -> vector<256x128xf32>
    %c0_9 = arith.constant 0 : index
    %c0_10 = arith.constant 0 : index
    %12 = vector.load %arg5[%c0_9, %c0_10] : memref<1x128xf32, #tpu.memory_space<vmem>>, vector<1x128xf32>
    %13 = vector.broadcast %12 : vector<1x128xf32> to vector<256x128xf32>
    %14 = arith.addf %11, %13 : vector<256x128xf32>
    %cst_11 = arith.constant 0.000000e+00 : f32
    %15 = vector.broadcast %cst_11 : f32 to vector<256x128xf32>
    %16 = arith.maximumf %14, %15 : vector<256x128xf32>
    %17 = arith.truncf %16 : vector<256x128xf32> to vector<256x128xbf16>
    %c0_12 = arith.constant 0 : index
    %c0_13 = arith.constant 0 : index
    %18 = vector.load %arg6[%c0_12, %c0_13] : memref<128x128xbf16, #tpu.memory_space<vmem>>, vector<128x128xbf16>
    %cst_14 = arith.constant dense<0.000000e+00> : vector<256x128xf32>
    %19 = tpu.matmul %17, %18, %cst_14 {dimension_numbers = #tpu.dot_dimension_numbers<[1], [0], [0], [1], [0, 0, 1, 1], [], []>} : vector<256x128xbf16>, vector<128x128xbf16>, vector<256x128xf32> -> vector<256x128xf32>
    %c0_15 = arith.constant 0 : index
    %c0_16 = arith.constant 0 : index
    %20 = vector.load %arg7[%c0_15, %c0_16] : memref<1x128xf32, #tpu.memory_space<vmem>>, vector<1x128xf32>
    %21 = vector.broadcast %20 : vector<1x128xf32> to vector<256x128xf32>
    %22 = arith.addf %19, %21 : vector<256x128xf32>
    %c0_17 = arith.constant 0 : index
    %c0_18 = arith.constant 0 : index
    %23 = vector.load %arg8[%c0_17, %c0_18] : memref<256x128xf32, #tpu.memory_space<vmem>>, vector<256x128xf32>
    tpu.vector_store %arg8[%c0_17, %c0_18], %22 {strides = array<i32>} : memref<256x128xf32, #tpu.memory_space<vmem>>, vector<256x128xf32>,
    return
  }
  func.func @transform_0(%arg0: i32) -> (i32, i32) {
    %c0_i32 = arith.constant 0 : i32
    %c0_i32_0 = arith.constant 0 : i32
    return %arg0, %c0_i32 : i32, i32
  }
  func.func @transform_1(%arg0: i32) -> (i32, i32) {
    %c0_i32 = arith.constant 0 : i32
    %c0_i32_0 = arith.constant 0 : i32
    %c0_i32_1 = arith.constant 0 : i32
    return %c0_i32, %c0_i32_0 : i32, i32
  }
  func.func @transform_2(%arg0: i32) -> (i32, i32) {
    %c0_i32 = arith.constant 0 : i32
    %c0_i32_0 = arith.constant 0 : i32
    %c0_i32_1 = arith.constant 0 : i32
    return %c0_i32, %c0_i32_0 : i32, i32
  }
  func.func @transform_3(%arg0: i32) -> (i32, i32) {
    %c0_i32 = arith.constant 0 : i32
    %c0_i32_0 = arith.constant 0 : i32
    %c0_i32_1 = arith.constant 0 : i32
    return %c0_i32, %c0_i32_0 : i32, i32
  }
  func.func @transform_4(%arg0: i32) -> (i32, i32) {
    %c0_i32 = arith.constant 0 : i32
    %c0_i32_0 = arith.constant 0 : i32
    %c0_i32_1 = arith.constant 0 : i32
    return %c0_i32, %c0_i32_0 : i32, i32
  }
  func.func @transform_5(%arg0: i32) -> (i32, i32) {
    %c0_i32 = arith.constant 0 : i32
    %c0_i32_0 = arith.constant 0 : i32
    %c0_i32_1 = arith.constant 0 : i32
    return %c0_i32, %c0_i32_0 : i32, i32
  }
  func.func @transform_6(%arg0: i32) -> (i32, i32) {
    %c0_i32 = arith.constant 0 : i32
    %c0_i32_0 = arith.constant 0 : i32
    %c0_i32_1 = arith.constant 0 : i32
    return %c0_i32, %c0_i32_0 : i32, i32
  }
  func.func @transform_7(%arg0: i32) -> (i32, i32) {
    %c0_i32 = arith.constant 0 : i32
    %c0_i32_0 = arith.constant 0 : i32
    return %arg0, %c0_i32 : i32, i32
  }
}

</mosaic_0001>

<bundles_post_ra>
// kernel: tpu_custom_call.1
= control target key start
LH: loop header
LB: loop body
LE: loop exit
PB: predicated region body
PF: predicated region fallthrough
CT: control target
= control target key end

     0   :  { %vm88_vm0 = vcmask 130048   ;;  %s1156_s0 = inlined_call_operand.vmem [shape: f32[256,16], index: 0, kind: input, shape index: {}]   ;;  %s1157_s1 = inlined_call_operand.vmem [shape: bf16[16,128], index: 1, kind: input, shape index: {}]   ;;  %s1158_s2 = inlined_call_operand.vmem [shape: f32[1,128], index: 2, kind: input, shape index: {}]   ;;  %s1159_s3 = inlined_call_operand.vmem [shape: bf16[128,128], index: 3, kind: input, shape index: {}]   ;;  %s1160_s4 = inlined_call_operand.vmem [shape: f32[1,128], index: 4, kind: input, shape index: {}]   ;;  %s1161_s5 = inlined_call_operand.vmem [shape: bf16[128,128], index: 5, kind: input, shape index: {}]   ;;  %s1162_s6 = inlined_call_operand.vmem [shape: f32[1,128], index: 6, kind: input, shape index: {}]   ;;  %s1163_s7 = inlined_call_operand.hbm [shape: f32[256,128], index: 7, kind: output, shape index: {}]  }
   0x1   :  { %v770_v0 = vld [vmem:[%s1157_s1] sm:$0xff]  ;;  %v29_v2 = vld [vmem:[%s1156_s0 + $0x8] sm:$0xff] }
   0x2   :  { %v28_v1 = vld [vmem:[%s1156_s0] sm:$0xff]  ;;  %144 = vmatpush.bf16.msra.mxu0 %v770_v0  ;;  %787 = vmatpush.bf16.msra.mxu3 %v770_v0 }
   0x3   :  { %v60_v3 = vpack.c.bf16 %v29_v2, %v28_v1 }
   0x4   :  { %12 = vsyncpa [#allocation3], 0  ;;  %v30_v4 = vld [vmem:[%s1156_s0 + $0x10] sm:$0xff]  ;;  %v31_v5 = vld [vmem:[%s1156_s0 + $0x18] sm:$0xff]  ;;  %s674_s28 = sshll.u32 %s1163_s7, 4  ;;  %s837_s29 = smov 128   ;;  %s675_s28 = int_to_ptr.hbm [resolvable:$true] %s674_s28 }
   0x5   :  { %690 = vmatmul.msk.bf16.vlgmr.msra.gmra.mxu0 %vm88_vm0, %v60_v3  ;;  %v61_v6 = vpack.c.bf16 %v31_v5, %v30_v4  ;;  %v32_v7 = vld [vmem:[%s1156_s0 + $0x20] sm:$0xff]  ;;  %v33_v8 = vld [vmem:[%s1156_s0 + $0x28] sm:$0xff]  ;;  %v34_v10 = vld [vmem:[%s1156_s0 + $0x30] sm:$0xff] }
   0x6   :  { %v62_v9 = vpack.c.bf16 %v33_v8, %v32_v7  ;;  %v35_v11 = vld [vmem:[%s1156_s0 + $0x38] sm:$0xff]  ;;  %v36_v13 = vld [vmem:[%s1156_s0 + $0x40] sm:$0xff]  ;;  %v37_v14 = vld [vmem:[%s1156_s0 + $0x48] sm:$0xff] }
   0x7   :  { %v63_v12 = vpack.c.bf16 %v35_v11, %v34_v10  ;;  %v64_v15 = vpack.c.bf16 %v37_v14, %v36_v13  ;;  %v778_v16 = vld [vmem:[%s1159_s3 + $0x38] sm:$0xff]  ;;  %v38_v17 = vld [vmem:[%s1156_s0 + $0x50] sm:$0xff]  ;;  %v776_v21 = vld [vmem:[%s1159_s3 + $0x28] sm:$0xff] }
   0x8   :  { %342 = vmatpush.bf16.msra.mxu1 %v778_v16  ;;  %788 = vmatpush.bf16.msrb.mxu3 %v778_v16  ;;  %v39_v18 = vld [vmem:[%s1156_s0 + $0x58] sm:$0xff]  ;;  %v777_v20 = vld [vmem:[%s1159_s3 + $0x30] sm:$0xff]  ;;  %v775_v22 = vld [vmem:[%s1159_s3 + $0x20] sm:$0xff] }
   0x9   :  { %v65_v19 = vpack.c.bf16 %v39_v18, %v38_v17  ;;  %v40_v23 = vld [vmem:[%s1156_s0 + $0x60] sm:$0xff]  ;;  %v41_v24 = vld [vmem:[%s1156_s0 + $0x68] sm:$0xff]  ;;  %v774_v25 = vld [vmem:[%s1159_s3 + $0x18] sm:$0xff] }
   0xa   :  { %v66_v26 = vpack.c.bf16 %v41_v24, %v40_v23  ;;  %v773_v27 = vld [vmem:[%s1159_s3 + $0x10] sm:$0xff]  ;;  %v772_v28 = vld [vmem:[%s1159_s3 + $0x8] sm:$0xff]  ;;  %v771_v29 = vld [vmem:[%s1159_s3] sm:$0xff]  ;;  %s838_s3 = smov 8  }
   0xb   :  { %v42_v30 = vld [vmem:[%s1156_s0 + $0x70] sm:$0xff]  ;;  %v43_v31 = vld [vmem:[%s1156_s0 + $0x78] sm:$0xff]  ;;  %v44_v33 = vld [vmem:[%s1156_s0 + $0x80] sm:$0xff] }
   0xc   :  { %343 = vmatpush.bf16.msra.mxu1 %v777_v20  ;;  %789 = vmatpush.bf16.msrb.mxu3 %v777_v20  ;;  %v67_v32 = vpack.c.bf16 %v43_v31, %v42_v30  ;;  %v45_v34 = vld [vmem:[%s1156_s0 + $0x88] sm:$0xff]  ;;  %v971_v37 = vld [vmem:[%s1158_s2] ss:$0 sm:$0xff]  ;;  %v46_v43 = vld [vmem:[%s1156_s0 + $0x90] sm:$0xff] }
   0xd   :  { %v68_v35 = vpack.c.bf16 %v45_v34, %v44_v33  ;;  %v47_v44 = vld [vmem:[%s1156_s0 + $0x98] sm:$0xff]  ;;  %v48_v53 = vld [vmem:[%s1156_s0 + $0xa0] sm:$0xff]  ;;  %v49_v54 = vld [vmem:[%s1156_s0 + $0xa8] sm:$0xff] }
   0xe   :  { %v69_v46 = vpack.c.bf16 %v47_v44, %v46_v43  ;;  %v70_v56 = vpack.c.bf16 %v49_v54, %v48_v53  ;;  %v54_v58 = vld [vmem:[%s1156_s0 + $0xd0] sm:$0xff]  ;;  %v55_v59 = vld [vmem:[%s1156_s0 + $0xd8] sm:$0xff]  ;;  %v56_v7 = vld [vmem:[%s1156_s0 + $0xe0] sm:$0xff] }
   0xf   :  { %v73_v60 = vpack.c.bf16 %v55_v59, %v54_v58  ;;  %v50_v2 = vld [vmem:[%s1156_s0 + $0xb0] sm:$0xff]  ;;  %v51_v3 = vld [vmem:[%s1156_s0 + $0xb8] sm:$0xff]  ;;  %v57_v8 = vld [vmem:[%s1156_s0 + $0xe8] sm:$0xff] }
  0x10   :  { %344 = vmatpush.bf16.msra.mxu1 %v776_v21  ;;  %790 = vmatpush.bf16.msrb.mxu3 %v776_v21  ;;  %v71_v5 = vpack.c.bf16 %v51_v3, %v50_v2  ;;  %v53_v16 = vld [vmem:[%s1156_s0 + $0xc8] sm:$0xff]  ;;  %v58_v20 = vld [vmem:[%s1156_s0 + $0xf0] sm:$0xff]  ;;  %v59_v21 = vld [vmem:[%s1156_s0 + $0xf8] sm:$0xff] }
  0x11   :  { %703 = vmatmul.msk.bf16.vlgmr.msra.gmra.mxu3 %vm88_vm0, %v73_v60  ;;  %v786_v33 = vld [vmem:[%s1161_s5 + $0x38] sm:$0xff]  ;;  %v1068_v3 = vld [vmem:[%s1160_s4] ss:$0 sm:$0xff] }
  0x12   :  { %547 = vmatpush.bf16.msra.mxu2 %v786_v33 }
  0x14   :  { %345 = vmatpush.bf16.msra.mxu1 %v775_v22  ;;  %791 = vmatpush.bf16.msrb.mxu3 %v775_v22  ;;  %v75_v22 = vpack.c.bf16 %v59_v21, %v58_v20 }
  0x15   :  { %691 = vmatmul.msk.bf16.gmra.mxu0 %vm88_vm0, %v61_v6 }
  0x18   :  { %346 = vmatpush.bf16.msra.mxu1 %v774_v25  ;;  %792 = vmatpush.bf16.msrb.mxu3 %v774_v25 }
  0x1c   :  { %347 = vmatpush.bf16.msra.mxu1 %v773_v27  ;;  %793 = vmatpush.bf16.msrb.mxu3 %v773_v27 }
  0x20   :  { %348 = vmatpush.bf16.msra.mxu1 %v772_v28  ;;  %794 = vmatpush.bf16.msrb.mxu3 %v772_v28 }
  0x24   :  { %349 = vmatpush.bf16.msra.mxu1 %v771_v29  ;;  %795 = vmatpush.bf16.msrb.mxu3 %v771_v29 }
  0x25   :  { %692 = vmatmul.msk.bf16.gmra.mxu0 %vm88_vm0, %v62_v9  ;;  %v74_v9 = vpack.c.bf16 %v57_v8, %v56_v7 }
  0x27   :  { %704 = vmatmul.msk.bf16.gmra.mxu3 %vm88_vm0, %v74_v9 }
  0x28   :  { %796 = vmatpush.bf16.msra.mxu3 %v786_v33 }
  0x35   :  { %693 = vmatmul.msk.bf16.gmra.mxu0 %vm88_vm0, %v63_v12 }
  0x37   :  { %705 = vmatmul.msk.bf16.gmra.mxu3 %vm88_vm0, %v75_v22 }
  0x45   :  { %694 = vmatmul.msk.bf16.gmra.mxu0 %vm88_vm0, %v64_v15  ;;  %v52_v15 = vld [vmem:[%s1156_s0 + $0xc0] sm:$0xff] }
  0x46   :  { %v72_v18 = vpack.c.bf16 %v53_v16, %v52_v15 }
  0x55   :  { %695 = vmatmul.msk.bf16.gmra.mxu0 %vm88_vm0, %v65_v19 }
  0x65   :  { %696 = vmatmul.msk.bf16.gmra.mxu0 %vm88_vm0, %v66_v26 }
  0x75   :  { %697 = vmatmul.msk.bf16.gmra.mxu0 %vm88_vm0, %v67_v32 }
  0x82   :  { %v146_v36 = vpop.f32.mrf.mxu0 }
  0x83   :  { %v147_v38 = vadd.f32 %v971_v37, %v146_v36 }
  0x85   :  { %698 = vmatmul.msk.bf16.gmra.mxu0 %vm88_vm0, %v68_v35  ;;  %v226_v41 = vmax.f32 %v147_v38, 0.0  ;;  %v785_v38 = vld [vmem:[%s1161_s5 + $0x30] sm:$0xff] }
  0x86   :  { %548 = vmatpush.bf16.msra.mxu2 %v785_v38  ;;  %797 = vmatpush.bf16.msra.mxu3 %v785_v38 }
  0x8a   :  { %v148_v39 = vpop.f32.mrf.mxu0 }
  0x8b   :  { %v149_v40 = vadd.f32 %v971_v37, %v148_v39 }
  0x8d   :  { %v227_v42 = vmax.f32 %v149_v40, 0.0  ;;  %v784_v40 = vld [vmem:[%s1161_s5 + $0x28] sm:$0xff] }
  0x8e   :  { %549 = vmatpush.bf16.msra.mxu2 %v784_v40  ;;  %798 = vmatpush.bf16.msra.mxu3 %v784_v40 }
  0x8f   :  { %v258_v45 = vpack.c.bf16 %v227_v42, %v226_v41  ;;  %v783_v41 = vld [vmem:[%s1161_s5 + $0x20] sm:$0xff] }
  0x91   :  { %350 = vmatmul.bf16.vlgmr.msra.gmra.mxu1 %v258_v45  ;;  %v782_v45 = vld [vmem:[%s1161_s5 + $0x18] sm:$0xff] }
  0x92   :  { %v151_v47 = vpop.f32.mrf.mxu0  ;;  %550 = vmatpush.bf16.msra.mxu2 %v783_v41  ;;  %799 = vmatpush.bf16.msra.mxu3 %v783_v41 }
  0x93   :  { %v152_v48 = vadd.f32 %v971_v37, %v151_v47 }
  0x95   :  { %699 = vmatmul.msk.bf16.gmra.mxu0 %vm88_vm0, %v69_v46  ;;  %v228_v51 = vmax.f32 %v152_v48, 0.0 }
  0x96   :  { %551 = vmatpush.bf16.msra.mxu2 %v782_v45  ;;  %800 = vmatpush.bf16.msra.mxu3 %v782_v45 }
  0x9a   :  { %v153_v49 = vpop.f32.mrf.mxu0 }
  0x9b   :  { %v154_v50 = vadd.f32 %v971_v37, %v153_v49  ;;  %v781_v49 = vld [vmem:[%s1161_s5 + $0x10] sm:$0xff] }
  0x9c   :  { %552 = vmatpush.bf16.msra.mxu2 %v781_v49  ;;  %801 = vmatpush.bf16.msra.mxu3 %v781_v49 }
  0x9d   :  { %v229_v52 = vmax.f32 %v154_v50, 0.0 }
  0x9f   :  { %v259_v55 = vpack.c.bf16 %v229_v52, %v228_v51  ;;  %v780_v51 = vld [vmem:[%s1161_s5 + $0x8] sm:$0xff]  ;;  %v779_v52 = vld [vmem:[%s1161_s5] sm:$0xff] }
  0xa0   :  { %553 = vmatpush.bf16.msra.mxu2 %v780_v51  ;;  %802 = vmatpush.bf16.msra.mxu3 %v780_v51 }
  0xa1   :  { %355 = vmatmul.bf16.gmra.mxu1 %v259_v55 }
  0xa2   :  { %v156_v57 = vpop.f32.mrf.mxu0 }
  0xa3   :  { %v157_v61 = vadd.f32 %v971_v37, %v156_v57 }
  0xa4   :  { %554 = vmatpush.bf16.msra.mxu2 %v779_v52  ;;  %803 = vmatpush.bf16.msra.mxu3 %v779_v52 }
  0xa5   :  { %700 = vmatmul.msk.bf16.gmra.mxu0 %vm88_vm0, %v70_v56  ;;  %v230_v0 = vmax.f32 %v157_v61, 0.0 }
  0xaa   :  { %v158_v62 = vpop.f32.mrf.mxu0 }
  0xab   :  { %v159_v63 = vadd.f32 %v971_v37, %v158_v62 }
  0xad   :  { %v231_v1 = vmax.f32 %v159_v63, 0.0 }
  0xaf   :  { %v260_v4 = vpack.c.bf16 %v231_v1, %v230_v0 }
  0xb1   :  { %360 = vmatmul.bf16.gmra.mxu1 %v260_v4 }
  0xb2   :  { %v161_v6 = vpop.f32.mrf.mxu0 }
  0xb3   :  { %v162_v10 = vadd.f32 %v971_v37, %v161_v6 }
  0xb5   :  { %701 = vmatmul.msk.bf16.gmra.mxu0 %vm88_vm0, %v71_v5  ;;  %v232_v13 = vmax.f32 %v162_v10, 0.0 }
  0xba   :  { %v163_v11 = vpop.f32.mrf.mxu0 }
  0xbb   :  { %v164_v12 = vadd.f32 %v971_v37, %v163_v11 }
  0xbd   :  { %v233_v14 = vmax.f32 %v164_v12, 0.0 }
  0xbf   :  { %v261_v17 = vpack.c.bf16 %v233_v14, %v232_v13 }
  0xc1   :  { %365 = vmatmul.bf16.gmra.mxu1 %v261_v17 }
  0xc2   :  { %v166_v19 = vpop.f32.mrf.mxu0 }
  0xc3   :  { %v167_v23 = vadd.f32 %v971_v37, %v166_v19 }
  0xc5   :  { %702 = vmatmul.msk.bf16.gmra.mxu0 %vm88_vm0, %v72_v18  ;;  %v234_v26 = vmax.f32 %v167_v23, 0.0 }
  0xca   :  { %v168_v24 = vpop.f32.mrf.mxu0 }
  0xcb   :  { %v169_v25 = vadd.f32 %v971_v37, %v168_v24 }
  0xcd   :  { %v235_v27 = vmax.f32 %v169_v25, 0.0 }
  0xcf   :  { %v262_v28 = vpack.c.bf16 %v235_v27, %v234_v26 }
  0xd1   :  { %370 = vmatmul.bf16.gmra.mxu1 %v262_v28 }
  0xd2   :  { %v171_v29 = vpop.f32.mrf.mxu0 }
  0xd3   :  { %v172_v30 = vadd.f32 %v971_v37, %v171_v29 }
  0xd5   :  { %v236_v34 = vmax.f32 %v172_v30, 0.0 }
  0xda   :  { %v173_v31 = vpop.f32.mrf.mxu0 }
  0xdb   :  { %v174_v32 = vadd.f32 %v971_v37, %v173_v31 }
  0xdd   :  { %v237_v35 = vmax.f32 %v174_v32, 0.0 }
  0xdf   :  { %v263_v36 = vpack.c.bf16 %v237_v35, %v236_v34 }
  0xe1   :  { %375 = vmatmul.bf16.gmra.mxu1 %v263_v36 }
  0xe2   :  { %v176_v39 = vpop.f32.mrf.mxu0 }
  0xe3   :  { %v177_v42 = vadd.f32 %v971_v37, %v176_v39 }
  0xe5   :  { %v238_v46 = vmax.f32 %v177_v42, 0.0 }
  0xea   :  { %v178_v43 = vpop.f32.mrf.mxu0 }
  0xeb   :  { %v179_v44 = vadd.f32 %v971_v37, %v178_v43 }
  0xed   :  { %v239_v47 = vmax.f32 %v179_v44, 0.0 }
  0xef   :  { %v264_v48 = vpack.c.bf16 %v239_v47, %v238_v46 }
  0xf1   :  { %380 = vmatmul.bf16.gmra.mxu1 %v264_v48  ;;  %v211_v48 = vpop.f32.mrf.mxu3 }
  0xf2   :  { %v181_v50 = vpop.f32.mrf.mxu0 }
  0xf3   :  { %v182_v53 = vadd.f32 %v971_v37, %v181_v50 }
  0xf5   :  { %v240_v56 = vmax.f32 %v182_v53, 0.0 }
  0xfa   :  { %v183_v54 = vpop.f32.mrf.mxu0 }
  0xfb   :  { %v184_v55 = vadd.f32 %v971_v37, %v183_v54 }
  0xfd   :  { %v241_v57 = vmax.f32 %v184_v55, 0.0 }
  0xff   :  { %v265_v58 = vpack.c.bf16 %v241_v57, %v240_v56 }
 0x101   :  { %385 = vmatmul.bf16.gmra.mxu1 %v265_v58  ;;  %v213_v58 = vpop.f32.mrf.mxu3 }
 0x102   :  { %v186_v59 = vpop.f32.mrf.mxu0 }
 0x103   :  { %v187_v60 = vadd.f32 %v971_v37, %v186_v59 }
 0x105   :  { %v242_v63 = vmax.f32 %v187_v60, 0.0 }
 0x10a   :  { %v188_v61 = vpop.f32.mrf.mxu0 }
 0x10b   :  { %v189_v62 = vadd.f32 %v971_v37, %v188_v61 }
 0x10d   :  { %v243_v0 = vmax.f32 %v189_v62, 0.0 }
 0x10e   :  { %v351_v1 = vpop.f32.mrf.mxu1 }
 0x10f   :  { %v266_v2 = vpack.c.bf16 %v243_v0, %v242_v63  ;;  %v352_v5 = vadd.f32 %v1068_v3, %v351_v1  ;;  %v216_v1 = vpop.f32.mrf.mxu3 }
 0x111   :  { %390 = vmatmul.bf16.gmra.mxu1 %v266_v2  ;;  %v431_v8 = vmax.f32 %v352_v5, 0.0  ;;  %v212_v2 = vadd.f32 %v971_v37, %v211_v48 }
 0x112   :  { %v191_v4 = vpop.f32.mrf.mxu0 }
 0x113   :  { %v192_v9 = vadd.f32 %v971_v37, %v191_v4  ;;  %v214_v4 = vadd.f32 %v971_v37, %v213_v58 }
 0x115   :  { %v244_v14 = vmax.f32 %v192_v9, 0.0  ;;  %v253_v9 = vmax.f32 %v214_v4, 0.0 }
 0x116   :  { %v353_v6 = vpop.f32.mrf.mxu1 }
 0x117   :  { %v354_v7 = vadd.f32 %v1068_v3, %v353_v6 }
 0x119   :  { %v432_v10 = vmax.f32 %v354_v7, 0.0 }
 0x11a   :  { %v193_v11 = vpop.f32.mrf.mxu0 }
 0x11b   :  { %v194_v12 = vadd.f32 %v971_v37, %v193_v11  ;;  %v463_v13 = vpack.c.bf16 %v432_v10, %v431_v8  ;;  %v252_v8 = vmax.f32 %v212_v2, 0.0 }
 0x11d   :  { %v245_v15 = vmax.f32 %v194_v12, 0.0  ;;  %555 = vmatmul.bf16.vlgmr.msra.gmra.mxu2 %v463_v13  ;;  %v271_v12 = vpack.c.bf16 %v253_v9, %v252_v8  ;;  %v218_v13 = vpop.f32.mrf.mxu3 }
 0x11e   :  { %v356_v16 = vpop.f32.mrf.mxu1 }
 0x11f   :  { %v267_v17 = vpack.c.bf16 %v245_v15, %v244_v14  ;;  %v357_v19 = vadd.f32 %v1068_v3, %v356_v16  ;;  %v217_v16 = vadd.f32 %v971_v37, %v216_v1 }
 0x121   :  { %395 = vmatmul.bf16.gmra.mxu1 %v267_v17  ;;  %v433_v22 = vmax.f32 %v357_v19, 0.0  ;;  %v219_v17 = vadd.f32 %v971_v37, %v218_v13 }
 0x122   :  { %v196_v18 = vpop.f32.mrf.mxu0 }
 0x123   :  { %v197_v23 = vadd.f32 %v971_v37, %v196_v18 }
 0x125   :  { %v246_v28 = vmax.f32 %v197_v23, 0.0  ;;  %v255_v23 = vmax.f32 %v219_v17, 0.0 }
 0x126   :  { %v358_v20 = vpop.f32.mrf.mxu1 }
 0x127   :  { %v359_v21 = vadd.f32 %v1068_v3, %v358_v20 }
 0x129   :  { %v434_v24 = vmax.f32 %v359_v21, 0.0  ;;  %v221_v21 = vpop.f32.mrf.mxu3 }
 0x12a   :  { %v198_v25 = vpop.f32.mrf.mxu0 }
 0x12b   :  { %v199_v26 = vadd.f32 %v971_v37, %v198_v25  ;;  %v464_v27 = vpack.c.bf16 %v434_v24, %v433_v22  ;;  %v254_v22 = vmax.f32 %v217_v16, 0.0 }
 0x12d   :  { %v247_v29 = vmax.f32 %v199_v26, 0.0  ;;  %560 = vmatmul.bf16.gmra.mxu2 %v464_v27  ;;  %v272_v26 = vpack.c.bf16 %v255_v23, %v254_v22 }
 0x12e   :  { %v361_v30 = vpop.f32.mrf.mxu1 }
 0x12f   :  { %v268_v31 = vpack.c.bf16 %v247_v29, %v246_v28  ;;  %v362_v33 = vadd.f32 %v1068_v3, %v361_v30  ;;  %v222_v30 = vadd.f32 %v971_v37, %v221_v21 }
 0x131   :  { %400 = vmatmul.bf16.gmra.mxu1 %v268_v31  ;;  %v435_v36 = vmax.f32 %v362_v33, 0.0  ;;  %v223_v27 = vpop.f32.mrf.mxu3 }
 0x132   :  { %v201_v32 = vpop.f32.mrf.mxu0  ;;  %v224_v31 = vadd.f32 %v971_v37, %v223_v27 }
 0x133   :  { %v202_v38 = vadd.f32 %v971_v37, %v201_v32 }
 0x135   :  { %v248_v43 = vmax.f32 %v202_v38, 0.0 }
 0x136   :  { %v363_v34 = vpop.f32.mrf.mxu1 }
 0x137   :  { %v364_v35 = vadd.f32 %v1068_v3, %v363_v34 }
 0x139   :  { %v436_v39 = vmax.f32 %v364_v35, 0.0  ;;  %v256_v35 = vmax.f32 %v222_v30, 0.0 }
 0x13a   :  { %v203_v40 = vpop.f32.mrf.mxu0 }
 0x13b   :  { %v204_v41 = vadd.f32 %v971_v37, %v203_v40  ;;  %v465_v42 = vpack.c.bf16 %v436_v39, %v435_v36  ;;  %v257_v36 = vmax.f32 %v224_v31, 0.0 }
 0x13d   :  { %v249_v44 = vmax.f32 %v204_v41, 0.0  ;;  %565 = vmatmul.bf16.gmra.mxu2 %v465_v42  ;;  %v273_v40 = vpack.c.bf16 %v257_v36, %v256_v35 }
 0x13e   :  { %v366_v45 = vpop.f32.mrf.mxu1 }
 0x13f   :  { %v269_v46 = vpack.c.bf16 %v249_v44, %v248_v43  ;;  %v367_v49 = vadd.f32 %v1068_v3, %v366_v45 }
 0x141   :  { %405 = vmatmul.bf16.gmra.mxu1 %v269_v46  ;;  %v437_v52 = vmax.f32 %v367_v49, 0.0 }
 0x142   :  { %v206_v47 = vpop.f32.mrf.mxu0 }
 0x143   :  { %v207_v53 = vadd.f32 %v971_v37, %v206_v47 }
 0x145   :  { %v250_v59 = vmax.f32 %v207_v53, 0.0  ;;  %v1105_v53 = vld [vmem:[%s1162_s6] ss:$0 sm:$0xff]  ;;  %s836_s6 = smov [#allocation2]  }
 0x146   :  { %v368_v50 = vpop.f32.mrf.mxu1  ;;  %s672_s25 = sshll.u32 %s836_s6, 4  ;;  %s673_s25 = int_to_ptr.vmem [resolvable:$true] %s672_s25 }
 0x147   :  { %v369_v51 = vadd.f32 %v1068_v3, %v368_v50 }
 0x149   :  { %v438_v54 = vmax.f32 %v369_v51, 0.0 }
 0x14a   :  { %v208_v55 = vpop.f32.mrf.mxu0 }
 0x14b   :  { %v209_v56 = vadd.f32 %v971_v37, %v208_v55  ;;  %v466_v57 = vpack.c.bf16 %v438_v54, %v437_v52 }
 0x14d   :  { %v251_v60 = vmax.f32 %v209_v56, 0.0  ;;  %570 = vmatmul.bf16.gmra.mxu2 %v466_v57 }
 0x14e   :  { %v371_v61 = vpop.f32.mrf.mxu1 }
 0x14f   :  { %v270_v62 = vpack.c.bf16 %v251_v60, %v250_v59  ;;  %v372_v63 = vadd.f32 %v1068_v3, %v371_v61 }
 0x151   :  { %410 = vmatmul.bf16.vlgmr.msrb.gmra.mxu3 %v270_v62  ;;  %v439_v6 = vmax.f32 %v372_v63, 0.0 }
 0x156   :  { %v373_v0 = vpop.f32.mrf.mxu1 }
 0x157   :  { %v374_v5 = vadd.f32 %v1068_v3, %v373_v0 }
 0x159   :  { %v440_v7 = vmax.f32 %v374_v5, 0.0 }
 0x15b   :  { %v467_v10 = vpack.c.bf16 %v440_v7, %v439_v6 }
 0x15d   :  { %575 = vmatmul.bf16.gmra.mxu2 %v467_v10 }
 0x15e   :  { %v376_v11 = vpop.f32.mrf.mxu1 }
 0x15f   :  { %v377_v14 = vadd.f32 %v1068_v3, %v376_v11 }
 0x161   :  { %415 = vmatmul.bf16.gmra.mxu3 %v271_v12  ;;  %v441_v19 = vmax.f32 %v377_v14, 0.0 }
 0x166   :  { %v378_v15 = vpop.f32.mrf.mxu1 }
 0x167   :  { %v379_v18 = vadd.f32 %v1068_v3, %v378_v15 }
 0x169   :  { %v442_v20 = vmax.f32 %v379_v18, 0.0 }
 0x16b   :  { %v468_v24 = vpack.c.bf16 %v442_v20, %v441_v19 }
 0x16d   :  { %580 = vmatmul.bf16.gmra.mxu2 %v468_v24 }
 0x16e   :  { %v381_v25 = vpop.f32.mrf.mxu1 }
 0x16f   :  { %v382_v28 = vadd.f32 %v1068_v3, %v381_v25 }
 0x171   :  { %420 = vmatmul.bf16.gmra.mxu3 %v272_v26  ;;  %v443_v33 = vmax.f32 %v382_v28, 0.0 }
 0x176   :  { %v383_v29 = vpop.f32.mrf.mxu1 }
 0x177   :  { %v384_v32 = vadd.f32 %v1068_v3, %v383_v29 }
 0x179   :  { %v444_v34 = vmax.f32 %v384_v32, 0.0 }
 0x17b   :  { %v469_v38 = vpack.c.bf16 %v444_v34, %v443_v33 }
 0x17d   :  { %585 = vmatmul.bf16.gmra.mxu2 %v469_v38 }
 0x17e   :  { %v386_v39 = vpop.f32.mrf.mxu1 }
 0x17f   :  { %v387_v41 = vadd.f32 %v1068_v3, %v386_v39 }
 0x181   :  { %425 = vmatmul.bf16.gmra.mxu3 %v273_v40  ;;  %v445_v44 = vmax.f32 %v387_v41, 0.0 }
 0x186   :  { %v388_v42 = vpop.f32.mrf.mxu1 }
 0x187   :  { %v389_v43 = vadd.f32 %v1068_v3, %v388_v42 }
 0x189   :  { %v446_v45 = vmax.f32 %v389_v43, 0.0 }
 0x18b   :  { %v470_v46 = vpack.c.bf16 %v446_v45, %v445_v44 }
 0x18d   :  { %590 = vmatmul.bf16.gmra.mxu2 %v470_v46 }
 0x18e   :  { %v391_v37 = vpop.f32.mrf.mxu1 }
 0x18f   :  { %v392_v47 = vadd.f32 %v1068_v3, %v391_v37 }
 0x191   :  { %v447_v50 = vmax.f32 %v392_v47, 0.0 }
 0x196   :  { %v393_v48 = vpop.f32.mrf.mxu1 }
 0x197   :  { %v394_v49 = vadd.f32 %v1068_v3, %v393_v48 }
 0x199   :  { %v448_v51 = vmax.f32 %v394_v49, 0.0 }
 0x19b   :  { %v471_v52 = vpack.c.bf16 %v448_v51, %v447_v50 }
 0x19d   :  { %595 = vmatmul.bf16.gmra.mxu2 %v471_v52 }
 0x19e   :  { %v396_v54 = vpop.f32.mrf.mxu1 }
 0x19f   :  { %v397_v57 = vadd.f32 %v1068_v3, %v396_v54 }
 0x1a0   :  { %v556_v55 = vpop.f32.mrf.mxu2 }
 0x1a1   :  { %v557_v56 = vadd.f32 %v1105_v53, %v556_v55  ;;  %v449_v61 = vmax.f32 %v397_v57, 0.0 }
 0x1a3   :  { %636 = vst [vmem:[#allocation2] sm:$0xff] %v557_v56 }
 0x1a6   :  { %v398_v58 = vpop.f32.mrf.mxu1 }
 0x1a7   :  { %v399_v59 = vadd.f32 %v1068_v3, %v398_v58 }
 0x1a8   :  { %v558_v60 = vpop.f32.mrf.mxu2 }
 0x1a9   :  { %v450_v62 = vmax.f32 %v399_v59, 0.0  ;;  %v559_v63 = vadd.f32 %v1105_v53, %v558_v60 }
 0x1ab   :  { %637 = vst [vmem:[#allocation2 + $0x8] sm:$0xff] %v559_v63  ;;  %v472_v0 = vpack.c.bf16 %v450_v62, %v449_v61 }
 0x1ad   :  { %600 = vmatmul.bf16.gmra.mxu2 %v472_v0 }
 0x1ae   :  { %v401_v1 = vpop.f32.mrf.mxu1 }
 0x1af   :  { %v402_v5 = vadd.f32 %v1068_v3, %v401_v1 }
 0x1b0   :  { %v561_v2 = vpop.f32.mrf.mxu2 }
 0x1b1   :  { %v562_v4 = vadd.f32 %v1105_v53, %v561_v2  ;;  %v451_v9 = vmax.f32 %v402_v5, 0.0 }
 0x1b3   :  { %638 = vst [vmem:[#allocation2 + $0x10] sm:$0xff] %v562_v4 }
 0x1b6   :  { %v403_v6 = vpop.f32.mrf.mxu1 }
 0x1b7   :  { %v404_v7 = vadd.f32 %v1068_v3, %v403_v6 }
 0x1b8   :  { %v563_v8 = vpop.f32.mrf.mxu2 }
 0x1b9   :  { %v452_v10 = vmax.f32 %v404_v7, 0.0  ;;  %v564_v11 = vadd.f32 %v1105_v53, %v563_v8 }
 0x1bb   :  { %639 = vst [vmem:[#allocation2 + $0x18] sm:$0xff] %v564_v11  ;;  %v473_v12 = vpack.c.bf16 %v452_v10, %v451_v9 }
 0x1bd   :  { %605 = vmatmul.bf16.gmra.mxu2 %v473_v12 }
 0x1be   :  { %v406_v13 = vpop.f32.mrf.mxu1 }
 0x1bf   :  { %v407_v16 = vadd.f32 %v1068_v3, %v406_v13 }
 0x1c0   :  { %v566_v14 = vpop.f32.mrf.mxu2 }
 0x1c1   :  { %v567_v15 = vadd.f32 %v1105_v53, %v566_v14  ;;  %v453_v20 = vmax.f32 %v407_v16, 0.0 }
 0x1c3   :  { %640 = vst [vmem:[#allocation2 + $0x20] sm:$0xff] %v567_v15 }
 0x1c6   :  { %v408_v17 = vpop.f32.mrf.mxu1 }
 0x1c7   :  { %v409_v18 = vadd.f32 %v1068_v3, %v408_v17 }
 0x1c8   :  { %v568_v19 = vpop.f32.mrf.mxu2 }
 0x1c9   :  { %v454_v21 = vmax.f32 %v409_v18, 0.0  ;;  %v569_v22 = vadd.f32 %v1105_v53, %v568_v19 }
 0x1cb   :  { %641 = vst [vmem:[#allocation2 + $0x28] sm:$0xff] %v569_v22  ;;  %v474_v23 = vpack.c.bf16 %v454_v21, %v453_v20 }
 0x1cd   :  { %610 = vmatmul.bf16.gmra.mxu2 %v474_v23 }
 0x1d0   :  { %v571_v24 = vpop.f32.mrf.mxu2 }
 0x1d1   :  { %v572_v25 = vadd.f32 %v1105_v53, %v571_v24 }
 0x1d3   :  { %642 = vst [vmem:[#allocation2 + $0x30] sm:$0xff] %v572_v25 }
 0x1d4   :  { %v411_v26 = vpop.f32.mrf.mxu3 }
 0x1d5   :  { %v412_v29 = vadd.f32 %v1068_v3, %v411_v26 }
 0x1d7   :  { %v455_v32 = vmax.f32 %v412_v29, 0.0 }
 0x1d8   :  { %v573_v27 = vpop.f32.mrf.mxu2 }
 0x1d9   :  { %v574_v28 = vadd.f32 %v1105_v53, %v573_v27 }
 0x1db   :  { %643 = vst [vmem:[#allocation2 + $0x38] sm:$0xff] %v574_v28 }
 0x1dc   :  { %v413_v30 = vpop.f32.mrf.mxu3 }
 0x1dd   :  { %v414_v31 = vadd.f32 %v1068_v3, %v413_v30 }
 0x1df   :  { %v456_v33 = vmax.f32 %v414_v31, 0.0 }
 0x1e0   :  { %v576_v34 = vpop.f32.mrf.mxu2 }
 0x1e1   :  { %v475_v35 = vpack.c.bf16 %v456_v33, %v455_v32  ;;  %v577_v36 = vadd.f32 %v1105_v53, %v576_v34 }
 0x1e3   :  { %644 = vst [vmem:[#allocation2 + $0x40] sm:$0xff] %v577_v36  ;;  %615 = vmatmul.bf16.vlgmr.msra.gmra.mxu3 %v475_v35 }
 0x1e4   :  { %v416_v38 = vpop.f32.mrf.mxu3 }
 0x1e5   :  { %v417_v41 = vadd.f32 %v1068_v3, %v416_v38 }
 0x1e7   :  { %v457_v44 = vmax.f32 %v417_v41, 0.0 }
 0x1e8   :  { %v578_v39 = vpop.f32.mrf.mxu2 }
 0x1e9   :  { %v579_v40 = vadd.f32 %v1105_v53, %v578_v39 }
 0x1eb   :  { %645 = vst [vmem:[#allocation2 + $0x48] sm:$0xff] %v579_v40 }
 0x1ec   :  { %v418_v42 = vpop.f32.mrf.mxu3 }
 0x1ed   :  { %v419_v43 = vadd.f32 %v1068_v3, %v418_v42 }
 0x1ef   :  { %v458_v45 = vmax.f32 %v419_v43, 0.0 }
 0x1f0   :  { %v581_v46 = vpop.f32.mrf.mxu2 }
 0x1f1   :  { %v582_v37 = vadd.f32 %v1105_v53, %v581_v46  ;;  %v476_v47 = vpack.c.bf16 %v458_v45, %v457_v44 }
 0x1f3   :  { %646 = vst [vmem:[#allocation2 + $0x50] sm:$0xff] %v582_v37  ;;  %620 = vmatmul.bf16.gmra.mxu3 %v476_v47 }
 0x1f4   :  { %v421_v48 = vpop.f32.mrf.mxu3 }
 0x1f5   :  { %v422_v51 = vadd.f32 %v1068_v3, %v421_v48 }
 0x1f7   :  { %v459_v55 = vmax.f32 %v422_v51, 0.0 }
 0x1f8   :  { %v583_v49 = vpop.f32.mrf.mxu2 }
 0x1f9   :  { %v584_v50 = vadd.f32 %v1105_v53, %v583_v49 }
 0x1fb   :  { %647 = vst [vmem:[#allocation2 + $0x58] sm:$0xff] %v584_v50 }
 0x1fc   :  { %v423_v52 = vpop.f32.mrf.mxu3 }
 0x1fd   :  { %v424_v54 = vadd.f32 %v1068_v3, %v423_v52 }
 0x1ff   :  { %v460_v56 = vmax.f32 %v424_v54, 0.0 }
 0x200   :  { %v586_v57 = vpop.f32.mrf.mxu2 }
 0x201   :  { %v587_v58 = vadd.f32 %v1105_v53, %v586_v57  ;;  %v477_v59 = vpack.c.bf16 %v460_v56, %v459_v55 }
 0x203   :  { %648 = vst [vmem:[#allocation2 + $0x60] sm:$0xff] %v587_v58  ;;  %625 = vmatmul.bf16.gmra.mxu3 %v477_v59 }
 0x204   :  { %v426_v60 = vpop.f32.mrf.mxu3 }
 0x205   :  { %v427_v63 = vadd.f32 %v1068_v3, %v426_v60 }
 0x207   :  { %v461_v2 = vmax.f32 %v427_v63, 0.0 }
 0x208   :  { %v588_v61 = vpop.f32.mrf.mxu2 }
 0x209   :  { %v589_v62 = vadd.f32 %v1105_v53, %v588_v61 }
 0x20b   :  { %649 = vst [vmem:[#allocation2 + $0x68] sm:$0xff] %v589_v62 }
 0x20c   :  { %v428_v0 = vpop.f32.mrf.mxu3 }
 0x20d   :  { %v429_v1 = vadd.f32 %v1068_v3, %v428_v0 }
 0x20f   :  { %v462_v4 = vmax.f32 %v429_v1, 0.0 }
 0x210   :  { %v591_v5 = vpop.f32.mrf.mxu2 }
 0x211   :  { %v592_v6 = vadd.f32 %v1105_v53, %v591_v5  ;;  %v478_v7 = vpack.c.bf16 %v462_v4, %v461_v2 }
 0x213   :  { %650 = vst [vmem:[#allocation2 + $0x70] sm:$0xff] %v592_v6  ;;  %630 = vmatmul.bf16.gmra.mxu3 %v478_v7 }
 0x218   :  { %v593_v8 = vpop.f32.mrf.mxu2 }
 0x219   :  { %v594_v9 = vadd.f32 %v1105_v53, %v593_v8 }
 0x21b   :  { %651 = vst [vmem:[#allocation2 + $0x78] sm:$0xff] %v594_v9 }
 0x220   :  { %v596_v10 = vpop.f32.mrf.mxu2 }
 0x221   :  { %v597_v11 = vadd.f32 %v1105_v53, %v596_v10 }
 0x223   :  { %652 = vst [vmem:[#allocation2 + $0x80] sm:$0xff] %v597_v11 }
 0x228   :  { %v598_v12 = vpop.f32.mrf.mxu2 }
 0x229   :  { %v599_v13 = vadd.f32 %v1105_v53, %v598_v12 }
 0x22b   :  { %653 = vst [vmem:[#allocation2 + $0x88] sm:$0xff] %v599_v13 }
 0x230   :  { %v601_v3 = vpop.f32.mrf.mxu2 }
 0x231   :  { %v602_v14 = vadd.f32 %v1105_v53, %v601_v3 }
 0x233   :  { %654 = vst [vmem:[#allocation2 + $0x90] sm:$0xff] %v602_v14 }
 0x238   :  { %v603_v15 = vpop.f32.mrf.mxu2 }
 0x239   :  { %v604_v16 = vadd.f32 %v1105_v53, %v603_v15 }
 0x23b   :  { %655 = vst [vmem:[#allocation2 + $0x98] sm:$0xff] %v604_v16 }
 0x240   :  { %v606_v17 = vpop.f32.mrf.mxu2 }
 0x241   :  { %v607_v18 = vadd.f32 %v1105_v53, %v606_v17 }
 0x243   :  { %656 = vst [vmem:[#allocation2 + $0xa0] sm:$0xff] %v607_v18 }
 0x248   :  { %v608_v19 = vpop.f32.mrf.mxu2 }
 0x249   :  { %v609_v20 = vadd.f32 %v1105_v53, %v608_v19 }
 0x24b   :  { %657 = vst [vmem:[#allocation2 + $0xa8] sm:$0xff] %v609_v20 }
 0x250   :  { %v611_v21 = vpop.f32.mrf.mxu2 }
 0x251   :  { %v612_v22 = vadd.f32 %v1105_v53, %v611_v21 }
 0x253   :  { %658 = vst [vmem:[#allocation2 + $0xb0] sm:$0xff] %v612_v22 }
 0x258   :  { %v613_v23 = vpop.f32.mrf.mxu2 }
 0x259   :  { %v614_v24 = vadd.f32 %v1105_v53, %v613_v23 }
 0x25b   :  { %659 = vst [vmem:[#allocation2 + $0xb8] sm:$0xff] %v614_v24 }
 0x266   :  { %v616_v25 = vpop.f32.mrf.mxu3 }
 0x267   :  { %v617_v26 = vadd.f32 %v1105_v53, %v616_v25 }
 0x269   :  { %660 = vst [vmem:[#allocation2 + $0xc0] sm:$0xff] %v617_v26 }
 0x26e   :  { %v618_v27 = vpop.f32.mrf.mxu3 }
 0x26f   :  { %v619_v28 = vadd.f32 %v1105_v53, %v618_v27 }
 0x271   :  { %661 = vst [vmem:[#allocation2 + $0xc8] sm:$0xff] %v619_v28 }
 0x276   :  { %v621_v29 = vpop.f32.mrf.mxu3 }
 0x277   :  { %v622_v30 = vadd.f32 %v1105_v53, %v621_v29 }
 0x279   :  { %662 = vst [vmem:[#allocation2 + $0xd0] sm:$0xff] %v622_v30 }
 0x27e   :  { %v623_v31 = vpop.f32.mrf.mxu3 }
 0x27f   :  { %v624_v32 = vadd.f32 %v1105_v53, %v623_v31 }
 0x281   :  { %663 = vst [vmem:[#allocation2 + $0xd8] sm:$0xff] %v624_v32 }
 0x286   :  { %v626_v33 = vpop.f32.mrf.mxu3 }
 0x287   :  { %v627_v34 = vadd.f32 %v1105_v53, %v626_v33 }
 0x289   :  { %664 = vst [vmem:[#allocation2 + $0xe0] sm:$0xff] %v627_v34 }
 0x28e   :  { %v628_v35 = vpop.f32.mrf.mxu3 }
 0x28f   :  { %v629_v36 = vadd.f32 %v1105_v53, %v628_v35 }
 0x291   :  { %665 = vst [vmem:[#allocation2 + $0xe8] sm:$0xff] %v629_v36 }
 0x296   :  { %v631_v38 = vpop.f32.mrf.mxu3 }
 0x297   :  { %v632_v39 = vadd.f32 %v1105_v53, %v631_v38 }
 0x299   :  { %666 = vst [vmem:[#allocation2 + $0xf0] sm:$0xff] %v632_v39 }
 0x29e   :  { %v633_v40 = vpop.f32.mrf.mxu3 }
 0x29f   :  { %v634_v41 = vadd.f32 %v1105_v53, %v633_v40 }
 0x2a1   :  { %667 = vst [vmem:[#allocation2 + $0xf8] sm:$0xff] %v634_v41 }
 0x2a2   :  { %680 = dma.vmem_to_hbm [thread:$0]  %s673_s25, 4096, %s675_s28, [#allocation3], %s837_s29, %s837_s29, %s838_s3  }
 0x2a3   :  { %834 = dma.done.wait [#allocation3], 4096  }
 0x2a4   :  { %835 = vsyncadd [#allocation3], 4294963200 }
 0x2a5   :  { %685 = vsyncpa [#allocation3], 1 }

</bundles_post_ra>
